<compile_context>
chip_gen: v7x
topology: tpu7x:2x2x1
jax: 0.10.0
libtpu: 0.0.40
codegen_flags: <defaults>
</compile_context>

<pallas_src>
import functools

import jax
import jax.numpy as jnp
from jax.experimental import pallas as pl
from jax.experimental.pallas import tpu as pltpu

_LANES = 128                      # vreg lane width
_BLOCK_ROWS = 8192                # (8192, 128) f32 = 4 MiB per buffer
_SINGLE_BLOCK_MAX_ROWS = 1024     # <= 512 KiB f32: one program, no grid
_VMEM_LIMIT_BYTES = 32 * 1024 * 1024  # covers double-buffered 4 MiB in+out on all gens


def _fma_kernel(w_ref, b_ref, x_ref, o_ref, *, compute_dtype):
    # w_ref, b_ref: SMEM scalars (shape (1,), f32).
    # x_ref, o_ref: lane-dense (rows, 128) VMEM tiles.
    x = x_ref[...].astype(compute_dtype)
    w = w_ref[0].astype(compute_dtype)
    b = b_ref[0].astype(compute_dtype)
    o_ref[...] = (x * w + b).astype(o_ref.dtype)


def _needs_f32_compute(dtype) -> bool:
    """Force f32 compute only where needed (v5e & older have no bf16 VALU)."""
    if dtype == jnp.float32:
        return False            # cast would be identity anyway
    if dtype != jnp.bfloat16:
        return True             # be conservative for other dtypes
    try:
        kind = jax.devices()[0].device_kind.lower()
    except Exception:
        return True
    return any(g in kind for g in ("v2", "v3", "v4", "v5"))


def _run_fma_2d(x2d, w_scalar, b_scalar, compute_dtype):
    """Apply y = x*w + b over a lane-dense (rows, 128) array with Pallas."""
    rows, _ = x2d.shape
    kernel = functools.partial(_fma_kernel, compute_dtype=compute_dtype)
    itemsize = x2d.dtype.itemsize
    cost = pl.CostEstimate(
        flops=2 * rows * _LANES,
        transcendentals=0,
        bytes_accessed=2 * rows * _LANES * itemsize,
    )
    out_shape = jax.ShapeDtypeStruct((rows, _LANES), x2d.dtype)

    if rows <= _SINGLE_BLOCK_MAX_ROWS:
        # Small case: one program; block == full array (no (8,128) divisibility
        # requirement when the block covers the whole array).
        return pl.pallas_call(
            kernel,
            out_shape=out_shape,
            in_specs=[
                pl.BlockSpec(memory_space=pltpu.SMEM),            # weight scalar
                pl.BlockSpec(memory_space=pltpu.SMEM),            # bias scalar
                pl.BlockSpec((rows, _LANES), lambda: (0, 0)),
            ],
            out_specs=pl.BlockSpec((rows, _LANES), lambda: (0, 0)),
            cost_estimate=cost,
        )(w_scalar, b_scalar, x2d)

    # Gridded case: guarantee >= 2 blocks (so the "parallel" axis can shard
    # across both v7x TensorCores), capped at 4 MiB (f32) per buffer.
    block_rows = min(_BLOCK_ROWS, 8 * pl.cdiv(pl.cdiv(rows, 2), 8))
    num_blocks = pl.cdiv(rows, block_rows)   # ragged last block handled by Pallas
    return pl.pallas_call(
        kernel,
        out_shape=out_shape,
        grid=(num_blocks,),
        in_specs=[
            pl.BlockSpec(memory_space=pltpu.SMEM),
            pl.BlockSpec(memory_space=pltpu.SMEM),
            pl.BlockSpec((block_rows, _LANES), lambda i: (i, 0)),
        ],
        out_specs=pl.BlockSpec((block_rows, _LANES), lambda i: (i, 0)),
        cost_estimate=cost,
        compiler_params=pltpu.CompilerParams(
            dimension_semantics=("parallel",),
            vmem_limit_bytes=_VMEM_LIMIT_BYTES,
        ),
    )(w_scalar, b_scalar, x2d)


@jax.jit
def conv1x1(x, weight, bias):
    """1x1 Conv2d(1 -> 1): y = x * w + b.  x: (N, 1, H, W)."""
    n, c, h, w = x.shape
    assert c == 1, "Net.conv is Conv2d(1, 1, 1)"
    orig_dtype = x.dtype
    w_f32 = weight.reshape((1,)).astype(jnp.float32)
    b_f32 = bias.reshape((1,)).astype(jnp.float32)
    compute_dtype = jnp.float32 if _needs_f32_compute(orig_dtype) else orig_dtype

    total = n * c * h * w
    main_rows = total // _LANES
    main_elems = main_rows * _LANES
    tail = total - main_elems

    flat = x.reshape((total,))  # free reshape

    if main_rows == 0:
        # Tiny tensor (< 128 elems): a custom call is pure overhead.
        y_flat = (flat.astype(jnp.float32) * w_f32[0] + b_f32[0]).astype(orig_dtype)
        return y_flat.reshape((n, c, h, w))

    if tail == 0:
        # Aligned path (includes the test shape): reshapes only, no copies.
        x2d = flat.reshape((main_rows, _LANES))
        y2d = _run_fma_2d(x2d, w_f32, b_f32, compute_dtype)
        return y2d.reshape((n, c, h, w))

    # Misaligned path: Pallas on the 128-aligned prefix, tiny XLA FMA on the
    # <128-element tail (no full-tensor pad copy).
    main2d = flat[:main_elems].reshape((main_rows, _LANES))
    y_main = _run_fma_2d(main2d, w_f32, b_f32, compute_dtype).reshape((main_elems,))
    tail_x = flat[main_elems:]
    tail_y = (tail_x.astype(jnp.float32) * w_f32[0] + b_f32[0]).astype(orig_dtype)
    return jnp.concatenate([y_main, tail_y]).reshape((n, c, h, w))


if __name__ == "__main__":
    key = jax.random.PRNGKey(0)
    kx, kw, kb = jax.random.split(key, 3)

    # Deterministic params mimicking PyTorch default init
    # (uniform in [-1/sqrt(fan_in), 1/sqrt(fan_in)], fan_in = 1*1*1 = 1)
    weight = jax.random.uniform(kw, (1, 1, 1, 1), minval=-1.0, maxval=1.0,
                                dtype=jnp.float32)
    bias = jax.random.uniform(kb, (1,), minval=-1.0, maxval=1.0,
                              dtype=jnp.float32)

    def ref(x):
        return x * weight.reshape(()) + bias.reshape(())

    # 1) Required small test, consistent with Conv2d(1, 1, 1): N=2, C=1, H=W=16.
    x = jax.random.normal(kx, (2, 1, 16, 16), dtype=jnp.float32)
    y = conv1x1(x, weight, bias)
    jax.block_until_ready(y)
    assert y.shape == x.shape
    assert jnp.allclose(y, ref(x), atol=1e-6), "mismatch (aligned single-block)"

    # 2) Exercise the gridded (megacore) path incl. a ragged edge block.
    x2 = jax.random.normal(kx, (1, 1, 640, 520), dtype=jnp.float32)  # rows = 2600
    y2 = conv1x1(x2, weight, bias)
    jax.block_until_ready(y2)
    assert jnp.allclose(y2, ref(x2), atol=1e-6), "mismatch (gridded path)"

    # 3) Exercise the non-128-aligned tail path.
    x3 = jax.random.normal(kx, (1, 1, 30, 30), dtype=jnp.float32)  # 900 elems
    y3 = conv1x1(x3, weight, bias)
    jax.block_until_ready(y3)
    assert jnp.allclose(y3, ref(x3), atol=1e-6), "mismatch (tail path)"

    print("KERNEL_OK")
</pallas_src>

<mosaic_0001>
module attributes {stable_mosaic.version = 11 : i64} {
  func.func @_fma_kernel(%arg0: memref<1xf32, #tpu.memory_space<smem>>, %arg1: memref<1xf32, #tpu.memory_space<smem>>, %arg2: memref<4x128xf32, #tpu.memory_space<vmem>>, %arg3: memref<4x128xf32, #tpu.memory_space<vmem>>) attributes {dimension_semantics = [], scalar_prefetch = 0 : i64, scratch_operands = 0 : i64, tpu.core_type = #tpu.core_type<tc>} {
    %c0 = arith.constant 0 : index
    %c0_0 = arith.constant 0 : index
    %0 = vector.load %arg2[%c0, %c0_0] : memref<4x128xf32, #tpu.memory_space<vmem>>, vector<4x128xf32>
    %c0_1 = arith.constant 0 : index
    %1 = memref.load %arg0[%c0_1] : memref<1xf32, #tpu.memory_space<smem>>
    %c0_2 = arith.constant 0 : index
    %2 = memref.load %arg1[%c0_2] : memref<1xf32, #tpu.memory_space<smem>>
    %3 = vector.broadcast %1 : f32 to vector<4x128xf32>
    %4 = arith.mulf %0, %3 : vector<4x128xf32>
    %5 = vector.broadcast %2 : f32 to vector<4x128xf32>
    %6 = arith.addf %4, %5 : vector<4x128xf32>
    %c0_3 = arith.constant 0 : index
    %c0_4 = arith.constant 0 : index
    %7 = vector.load %arg3[%c0_3, %c0_4] : memref<4x128xf32, #tpu.memory_space<vmem>>, vector<4x128xf32>
    tpu.vector_store %arg3[%c0_3, %c0_4], %6 {strides = array<i32>} : memref<4x128xf32, #tpu.memory_space<vmem>>, vector<4x128xf32>,
    return
  }
}

</mosaic_0001>

<bundles_post_ra>
// kernel: conv1x1.1
= control target key start
LH: loop header
LB: loop body
LE: loop exit
PB: predicated region body
PF: predicated region fallthrough
CT: control target
= control target key end

     0   :  { %s60_s0 = inlined_call_operand.<no memory space> [shape: f32[1], index: 0, kind: input, shape index: {}]   ;;  %s61_s1 = inlined_call_operand.<no memory space> [shape: f32[1], index: 1, kind: input, shape index: {}]   ;;  %s62_s2 = inlined_call_operand.vmem [shape: f32[4,128], index: 2, kind: input, shape index: {}]   ;;  %s63_s3 = inlined_call_operand.vmem [shape: f32[4,128], index: 3, kind: output, shape index: {}]  }
   0x1   :  { %v16_v0 = vld [vmem:[%s62_s2] sm:$0xf]  ;;  %v19_v1 = vstv %s60_s0  ;;  %v21_v2 = vstv %s61_s1 }
   0x2   :  { %v20_v3 = vmul.f32 %v19_v1, %v16_v0 }
   0x4   :  { %v22_v4 = vadd.f32 %v21_v2, %v20_v3 }
   0x6   :  { %23 = vst [vmem:[%s63_s3] sm:$0xf] %v22_v4 }

</bundles_post_ra>
